<compile_context>
chip_gen: v7x
topology: tpu7x:2x2x1
jax: 0.10.0
libtpu: 0.0.40
codegen_flags: <defaults>
</compile_context>

<pallas_src>
import jax
import jax.numpy as jnp
from jax.experimental import pallas as pl
from jax.experimental.pallas import tpu as pltpu


_LANES = 128
_MAX_WIDTH = 8192            # cap on lane-dense slab width (elements)
_MIN_CHUNK_BYTES = 1 << 20   # >=1 MiB per DMA chunk amortizes descriptor cost
_MAX_CHUNKS = 8              # number of concurrently in-flight DMA descriptors


def _resolve_shape(total, shape):
    """PyTorch-style view shape resolution (handles a single -1, validates size)."""
    shape = list(shape)
    neg = [i for i, s in enumerate(shape) if s == -1]
    if len(neg) > 1:
        raise ValueError("only one dimension can be inferred")
    known = 1
    for s in shape:
        if s != -1:
            known *= s
    if neg:
        if known == 0 or total % known != 0:
            raise ValueError(f"shape {tuple(shape)} is invalid for input of size {total}")
        shape[neg[0]] = total // known
    elif known != total:
        raise ValueError(f"shape {tuple(shape)} is invalid for input of size {total}")
    return tuple(shape)


def _make_dma_copy_kernel(chunks, full_rows):
    """HBM->HBM identity copy: start one DMA per static chunk, then wait all."""

    def kernel(x_hbm, o_hbm, sems):
        copies = []
        for idx, (start, size) in enumerate(chunks):
            if start == 0 and size == full_rows:
                # Whole-array DMA: no slicing needed (also covers the 1-D
                # ragged slab, so there are no alignment concerns).
                src, dst = x_hbm, o_hbm
            else:
                src = x_hbm.at[pl.ds(start, size)]
                dst = o_hbm.at[pl.ds(start, size)]
            cp = pltpu.make_async_copy(src, dst, sems.at[idx])
            cp.start()
            copies.append(cp)
        for cp in copies:
            cp.wait()

    return kernel


def _pallas_identity_copy(x):
    """Route x's bytes through a single Pallas HBM->HBM DMA (no VMEM staging)."""
    total = int(x.size)
    if total == 0:
        return x
    itemsize = jnp.dtype(x.dtype).itemsize

    # Widest lane-dense width (power-of-two multiple of 128 lanes) that divides
    # the element count exactly.  Ragged counts (width == 0) fall back to a
    # single whole-array 1-D DMA.
    width = 0
    w = _LANES
    while w <= _MAX_WIDTH and total % w == 0:
        width = w
        w *= 2

    if width:
        rows = total // width
        slab = jnp.reshape(x, (rows, width))      # metadata-only (contiguous)
        row_bytes = width * itemsize
        n_chunks = int(max(1, min(_MAX_CHUNKS,
                                  (rows * row_bytes) // _MIN_CHUNK_BYTES,
                                  rows)))
    else:
        rows = total
        slab = jnp.reshape(x, (rows,))            # metadata-only
        n_chunks = 1

    chunk = rows // n_chunks
    boundaries = [(i * chunk, chunk) for i in range(n_chunks)]
    tail = rows - n_chunks * chunk
    if tail:                                      # static tail chunk
        boundaries.append((n_chunks * chunk, tail))

    out_slab = pl.pallas_call(
        _make_dma_copy_kernel(boundaries, rows),
        out_shape=jax.ShapeDtypeStruct(slab.shape, slab.dtype),
        grid_spec=pltpu.PrefetchScalarGridSpec(
            num_scalar_prefetch=0,
            grid=(1,),
            in_specs=[pl.BlockSpec(memory_space=pl.ANY)],
            out_specs=pl.BlockSpec(memory_space=pl.ANY),
            scratch_shapes=[pltpu.SemaphoreType.DMA((len(boundaries),))],
        ),
        compiler_params=pltpu.CompilerParams(
            dimension_semantics=("arbitrary",),
        ),
    )(slab)
    return jnp.reshape(out_slab, x.shape)


def pallas_view(x, shape, *, via_pallas=False):
    """Reproduces `x.view(*shape)`.

    via_pallas=False (default): metadata-only reshape -- zero data movement,
      the correct cost model for `view`.
    via_pallas=True: additionally route the bytes through a single Pallas
      HBM->HBM DMA, then apply the reshape as metadata.
    """
    out_shape = _resolve_shape(int(x.size), shape)
    if via_pallas:
        x = _pallas_identity_copy(x)
    return jnp.reshape(x, out_shape)


if __name__ == "__main__":
    key = jax.random.PRNGKey(0)
    # Small NCHW-like input consistent with a conv stack feeding View.
    x = jax.random.normal(key, (2, 4, 16, 16), dtype=jnp.float32)

    # View((2, -1)): flatten everything but the batch dim (typical before an
    # LSTM / linear layer in the original model).
    target_shape = (2, -1)
    ref = jnp.reshape(x, (2, 4 * 16 * 16))

    # Pallas copy path: bytes flow through the DMA kernel exactly once.
    out = pallas_view(x, target_shape, via_pallas=True)
    out = jax.block_until_ready(out)
    assert out.shape == ref.shape, (out.shape, ref.shape)
    assert out.dtype == ref.dtype
    assert bool(jnp.all(out == ref))

    # Ragged element-count path (not a multiple of 128): whole-array DMA.
    x_ragged = jax.random.normal(key, (3, 5, 7), dtype=jnp.float32)
    out_r = jax.block_until_ready(pallas_view(x_ragged, (-1,), via_pallas=True))
    assert bool(jnp.all(out_r == jnp.reshape(x_ragged, (-1,))))

    # Default metadata-only path (the real cost model of `view`).
    out_meta = jax.block_until_ready(pallas_view(x, target_shape))
    assert out_meta.shape == ref.shape
    assert bool(jnp.all(out_meta == ref))

    print("KERNEL_OK")
</pallas_src>

<mosaic_0001>
module attributes {stable_mosaic.version = 11 : i64} {
  func.func @kernel(%arg0: i32, %arg1: memref<1x2048xf32, #tpu.memory_space<any>>, %arg2: memref<1x2048xf32, #tpu.memory_space<any>>, %arg3: memref<1x!tpu.dma_semaphore, #tpu.memory_space<semaphore_mem>>) attributes {dimension_semantics = [#tpu.dimension_semantics<arbitrary>], iteration_bounds = array<i64: 1>, scalar_prefetch = 0 : i64, scratch_operands = 1 : i64, tpu.core_type = #tpu.core_type<tc>, window_params = [{}, {}]} {
    %c0_i32 = arith.constant 0 : i32
    %0 = tpu.memref_slice %arg3[%c0_i32] : memref<1x!tpu.dma_semaphore, #tpu.memory_space<semaphore_mem>> -> memref<1x!tpu.dma_semaphore, #tpu.memory_space<semaphore_mem>>
    %1 = tpu.memref_squeeze %0 : memref<1x!tpu.dma_semaphore, #tpu.memory_space<semaphore_mem>> -> memref<!tpu.dma_semaphore, #tpu.memory_space<semaphore_mem>>
    tpu.enqueue_dma source(%arg1 : memref<1x2048xf32, #tpu.memory_space<any>>) target(%arg2 : memref<1x2048xf32, #tpu.memory_space<any>>) target_semaphore(%1 : memref<!tpu.dma_semaphore, #tpu.memory_space<semaphore_mem>>)
    %c0_i32_0 = arith.constant 0 : i32
    %2 = tpu.memref_slice %arg3[%c0_i32_0] : memref<1x!tpu.dma_semaphore, #tpu.memory_space<semaphore_mem>> -> memref<1x!tpu.dma_semaphore, #tpu.memory_space<semaphore_mem>>
    %3 = tpu.memref_squeeze %2 : memref<1x!tpu.dma_semaphore, #tpu.memory_space<semaphore_mem>> -> memref<!tpu.dma_semaphore, #tpu.memory_space<semaphore_mem>>
    tpu.wait_dma2 semaphore(%3 : memref<!tpu.dma_semaphore, #tpu.memory_space<semaphore_mem>>) src(%arg1 : memref<1x2048xf32, #tpu.memory_space<any>>) dst(%arg2 : memref<1x2048xf32, #tpu.memory_space<any>>)
    return
  }
}

</mosaic_0001>

<bundles_post_ra>
// kernel: tpu_custom_call.1
= control target key start
LH: loop header
LB: loop body
LE: loop exit
PB: predicated region body
PF: predicated region fallthrough
CT: control target
= control target key end

     0   :  { %s34_s6 = smov [#allocation2]   ;;  %s35_s7 = smov [#allocation3]   ;;  %s53_s0 = inlined_call_operand.hbm [shape: f32[1,2048], index: 0, kind: input, shape index: {}]   ;;  %s54_s1 = inlined_call_operand.hbm [shape: f32[1,2048], index: 1, kind: output, shape index: {}]  }
   0x1   :  { %s36_s8 = smov 0  }
   0x2   :  { %18 = dma.general %s53_s0, 256, %s54_s1, %s34_s6, %s35_s7, [#allocation4], %s36_s8, 0  }
   0x3   :  { %32 = dma.done.wait [#allocation2], 256 }
   0x4   :  { %33 = vsyncadd [#allocation2], 4294967040 }
   0x5   :  { %22 = vsyncmov [#allocation2] }
   0x8   :  { %s23_s13 = vpop.sfrf %22 }
   0x9   :  { %p28_p0 = scmp.ne.s32.totalorder %s23_s13, 0 }
   0xb   :  { %27 = shalt.err (%p28_p0)  }

</bundles_post_ra>
